<compile_context>
chip_gen: v7x
topology: tpu7x:2x2x1
jax: 0.10.0
libtpu: 0.0.40
codegen_flags: <defaults>
</compile_context>

<pallas_src>
import functools

import jax
import jax.numpy as jnp
from jax.experimental import pallas as pl
from jax.experimental.pallas import tpu as pltpu


def _sfdp_kernel(x1_ref, x2_ref, bits_ref, o_ref, *, inv_scale):
    x1 = x1_ref[...]                       # (TB, S, D) f32
    x2 = x2_ref[...]                       # (TB, S, D) f32
    bits = bits_ref[...]                   # (TB, S, S) uint32

    # bf16 operands for the MXU, f32 accumulation. Fold 1/x3 into x2 (O(S*D)).
    x1_bf = x1.astype(jnp.bfloat16)
    x2s_bf = (x2 * inv_scale).astype(jnp.bfloat16)

    # v1 / x3: contract last dims of both operands (no transpose), batch dim 0.
    s = jax.lax.dot_general(
        x1_bf, x2s_bf,
        dimension_numbers=(((2,), (2,)), ((0,), (0,))),
        preferred_element_type=jnp.float32,
    )                                      # (TB, S, S) f32

    # softmax along the last axis (f32), with the dropout keep-scale (2.0 for
    # p=0.5) folded into the reciprocal of the row sums.
    m = jnp.max(s, axis=-1, keepdims=True)
    e = jnp.exp(s - m)
    denom = jnp.sum(e, axis=-1, keepdims=True)
    inv = 2.0 * pl.reciprocal(denom, approx=True)      # (TB, S, 1)

    # dropout(p=0.5): keep iff the full 32-bit random word < 2^31.
    keep = bits < jnp.uint32(1 << 31)
    probs = jnp.where(keep, e * inv, 0.0).astype(jnp.bfloat16)

    # v5 = dropped @ x1 ; v6 = v5 + x2
    out = jax.lax.dot_general(
        probs, x1_bf,
        dimension_numbers=(((2,), (1,)), ((0,), (0,))),
        preferred_element_type=jnp.float32,
    )                                      # (TB, S, D) f32
    o_ref[...] = (out + x2).astype(o_ref.dtype)


def _pick_batch_tile(B, S, D, budget_bytes=32 * 1024 * 1024):
    # Rough per-batch-element VMEM footprint: double-buffered x1/x2/out tiles,
    # double-buffered uint32 bits tile, and ~3 live f32 (S, S) temporaries.
    per_b = 3 * (2 * S * D * 4) + (2 * S * S * 4) + 3 * (S * S * 4)
    tb = max(1, min(B, budget_bytes // max(per_b, 1)))
    while B % tb:
        tb -= 1
    return tb


def sfdp_model(x1, x2, x3, *, dropout_key):
    """x1, x2: (B, S, D) float32; x3: Python scalar; returns (B, S, D) float32."""
    B, S, D = x1.shape
    assert x2.shape == (B, S, D)

    # Dropout randomness generated outside the kernel (portable across TPU
    # generations and interpret mode).  Never bit-matches PyTorch's RNG.
    bits = jax.random.bits(dropout_key, (B, S, S), dtype=jnp.uint32)

    TB = _pick_batch_tile(B, S, D)
    grid = (B // TB,)

    kernel = functools.partial(_sfdp_kernel, inv_scale=float(1.0 / x3))

    # TODO(synk): for S >~ 1-2K the (S, S) temporaries exceed the scoped VMEM
    # budget (hits v7x's 64 MiB ~2x sooner than v6e); that regime needs a
    # flash-style KV-tiled inner loop instead of this one-shot softmax.
    return pl.pallas_call(
        kernel,
        out_shape=jax.ShapeDtypeStruct((B, S, D), jnp.float32),
        grid=grid,
        in_specs=[
            pl.BlockSpec((TB, S, D), lambda i: (i, 0, 0)),   # x1
            pl.BlockSpec((TB, S, D), lambda i: (i, 0, 0)),   # x2
            pl.BlockSpec((TB, S, S), lambda i: (i, 0, 0)),   # dropout bits
        ],
        out_specs=pl.BlockSpec((TB, S, D), lambda i: (i, 0, 0)),
        compiler_params=pltpu.CompilerParams(
            dimension_semantics=("parallel",),
        ),
    )(x1, x2, bits)


if __name__ == "__main__":
    key = jax.random.PRNGKey(0)
    k1, k2, kd = jax.random.split(key, 3)

    B, S, D = 2, 8, 32
    x1 = jax.random.normal(k1, (B, S, D), dtype=jnp.float32)
    x2 = jax.random.normal(k2, (B, S, D), dtype=jnp.float32)
    x3 = 8.0  # scalar divisor (sqrt(d_k)-style scaling)

    out = sfdp_model(x1, x2, x3, dropout_key=kd)
    out = jax.block_until_ready(out)
    assert out.shape == (B, S, D) and out.dtype == jnp.float32
    assert bool(jnp.all(jnp.isfinite(out)))
    print("KERNEL_OK")
</pallas_src>

<mosaic_0001>
module attributes {stable_mosaic.version = 11 : i64} {
  func.func @_sfdp_kernel(%arg0: i32, %arg1: memref<2x8x32xf32, #tpu.memory_space<vmem>>, %arg2: memref<2x8x32xf32, #tpu.memory_space<vmem>>, %arg3: memref<2x8x8xi32, #tpu.memory_space<vmem>>, %arg4: memref<2x8x32xf32, #tpu.memory_space<vmem>>) attributes {dimension_semantics = [#tpu.dimension_semantics<parallel>], iteration_bounds = array<i64: 1>, scalar_prefetch = 0 : i64, scratch_operands = 0 : i64, tpu.core_type = #tpu.core_type<tc>, window_params = [{transform_indices = @transform_0, window_bounds = array<i64: 2, 8, 32>}, {transform_indices = @transform_1, window_bounds = array<i64: 2, 8, 32>}, {transform_indices = @transform_2, window_bounds = array<i64: 2, 8, 8>}, {transform_indices = @transform_3, window_bounds = array<i64: 2, 8, 32>}]} {
    %c0 = arith.constant 0 : index
    %c0_0 = arith.constant 0 : index
    %c0_1 = arith.constant 0 : index
    %0 = vector.load %arg1[%c0, %c0_0, %c0_1] : memref<2x8x32xf32, #tpu.memory_space<vmem>>, vector<2x8x32xf32>
    %c0_2 = arith.constant 0 : index
    %c0_3 = arith.constant 0 : index
    %c0_4 = arith.constant 0 : index
    %1 = vector.load %arg2[%c0_2, %c0_3, %c0_4] : memref<2x8x32xf32, #tpu.memory_space<vmem>>, vector<2x8x32xf32>
    %c0_5 = arith.constant 0 : index
    %c0_6 = arith.constant 0 : index
    %c0_7 = arith.constant 0 : index
    %2 = vector.load %arg3[%c0_5, %c0_6, %c0_7] : memref<2x8x8xi32, #tpu.memory_space<vmem>>, vector<2x8x8xi32>
    %3 = arith.truncf %0 : vector<2x8x32xf32> to vector<2x8x32xbf16>
    %cst = arith.constant 1.250000e-01 : f32
    %4 = vector.broadcast %cst : f32 to vector<2x8x32xf32>
    %5 = arith.mulf %1, %4 : vector<2x8x32xf32>
    %6 = arith.truncf %5 : vector<2x8x32xf32> to vector<2x8x32xbf16>
    %cst_8 = arith.constant dense<0.000000e+00> : vector<2x8x8xf32>
    %7 = tpu.matmul %3, %6, %cst_8 {dimension_numbers = #tpu.dot_dimension_numbers<[2], [2], [1], [1], [0, 0, 0, 1, 1, 1], [0], [0]>} : vector<2x8x32xbf16>, vector<2x8x32xbf16>, vector<2x8x8xf32> -> vector<2x8x8xf32>
    %cst_9 = arith.constant dense<0xFF800000> : vector<2x8xf32>
    %8 = vector.multi_reduction <maximumf>, %7, %cst_9 [2] : vector<2x8x8xf32> to vector<2x8xf32>
    %9 = vector.shape_cast %8 : vector<2x8xf32> to vector<2x8x1xf32>
    %10 = vector.broadcast %9 : vector<2x8x1xf32> to vector<2x8x8xf32>
    %11 = arith.subf %7, %10 : vector<2x8x8xf32>
    %12 = math.exp %11 : vector<2x8x8xf32>
    %cst_10 = arith.constant dense<0.000000e+00> : vector<2x8xf32>
    %13 = vector.multi_reduction <add>, %12, %cst_10 [2] : vector<2x8x8xf32> to vector<2x8xf32>
    %14 = vector.shape_cast %13 : vector<2x8xf32> to vector<2x8x1xf32>
    %15 = tpu.reciprocal %14 {approx = true} : vector<2x8x1xf32> -> vector<2x8x1xf32>
    %cst_11 = arith.constant 2.000000e+00 : f32
    %16 = vector.broadcast %cst_11 : f32 to vector<2x8x1xf32>
    %17 = arith.mulf %16, %15 : vector<2x8x1xf32>
    %c-2147483648_i32 = arith.constant -2147483648 : i32
    %18 = vector.broadcast %c-2147483648_i32 : i32 to vector<2x8x8xi32>
    %19 = arith.cmpi ult, %2, %18 : vector<2x8x8xi32>
    %20 = vector.broadcast %17 : vector<2x8x1xf32> to vector<2x8x8xf32>
    %21 = arith.mulf %12, %20 : vector<2x8x8xf32>
    %cst_12 = arith.constant 0.000000e+00 : f32
    %22 = vector.broadcast %cst_12 : f32 to vector<2x8x8xf32>
    %23 = arith.select %19, %21, %22 : vector<2x8x8xi1>, vector<2x8x8xf32>
    %24 = arith.truncf %23 : vector<2x8x8xf32> to vector<2x8x8xbf16>
    %cst_13 = arith.constant dense<0.000000e+00> : vector<2x8x32xf32>
    %25 = tpu.matmul %24, %3, %cst_13 {dimension_numbers = #tpu.dot_dimension_numbers<[2], [1], [1], [2], [0, 0, 0, 1, 1, 2], [0], [0]>} : vector<2x8x8xbf16>, vector<2x8x32xbf16>, vector<2x8x32xf32> -> vector<2x8x32xf32>
    %26 = arith.addf %25, %1 : vector<2x8x32xf32>
    %c0_14 = arith.constant 0 : index
    %c0_15 = arith.constant 0 : index
    %c0_16 = arith.constant 0 : index
    %27 = vector.load %arg4[%c0_14, %c0_15, %c0_16] : memref<2x8x32xf32, #tpu.memory_space<vmem>>, vector<2x8x32xf32>
    tpu.vector_store %arg4[%c0_14, %c0_15, %c0_16], %26 {strides = array<i32>} : memref<2x8x32xf32, #tpu.memory_space<vmem>>, vector<2x8x32xf32>,
    return
  }
  func.func @transform_0(%arg0: i32) -> (i32, i32, i32) {
    %c0_i32 = arith.constant 0 : i32
    %c0_i32_0 = arith.constant 0 : i32
    %c0_i32_1 = arith.constant 0 : i32
    return %arg0, %c0_i32, %c0_i32_0 : i32, i32, i32
  }
  func.func @transform_1(%arg0: i32) -> (i32, i32, i32) {
    %c0_i32 = arith.constant 0 : i32
    %c0_i32_0 = arith.constant 0 : i32
    %c0_i32_1 = arith.constant 0 : i32
    return %arg0, %c0_i32, %c0_i32_0 : i32, i32, i32
  }
  func.func @transform_2(%arg0: i32) -> (i32, i32, i32) {
    %c0_i32 = arith.constant 0 : i32
    %c0_i32_0 = arith.constant 0 : i32
    %c0_i32_1 = arith.constant 0 : i32
    return %arg0, %c0_i32, %c0_i32_0 : i32, i32, i32
  }
  func.func @transform_3(%arg0: i32) -> (i32, i32, i32) {
    %c0_i32 = arith.constant 0 : i32
    %c0_i32_0 = arith.constant 0 : i32
    %c0_i32_1 = arith.constant 0 : i32
    return %arg0, %c0_i32, %c0_i32_0 : i32, i32, i32
  }
}

</mosaic_0001>

<bundles_post_ra>
// kernel: tpu_custom_call.1
= control target key start
LH: loop header
LB: loop body
LE: loop exit
PB: predicated region body
PF: predicated region fallthrough
CT: control target
= control target key end

     0   :  { %8 = vsyncpa [#allocation3], 0  ;;  %s569_s0 = inlined_call_operand.hbm [shape: f32[2,8,32], index: 0, kind: input, shape index: {}]   ;;  %s570_s1 = inlined_call_operand.hbm [shape: f32[2,8,32], index: 1, kind: input, shape index: {}]   ;;  %s571_s2 = inlined_call_operand.hbm [shape: u32[2,8,8], index: 2, kind: input, shape index: {}]   ;;  %s572_s3 = inlined_call_operand.hbm [shape: f32[2,8,32], index: 3, kind: output, shape index: {}]  }
   0x1   :  { %9 = vsyncpa [#allocation6], 0 }
   0x2   :  { %10 = vsyncpa [#allocation4], 0  ;;  %s450_s12 = smov [#allocation5]   ;;  %s451_s14 = smov [#allocation2]  }
   0x3   :  { %s28_s13 = sshll.u32 %s450_s12, 4  ;;  %s16_s15 = sshll.u32 %s451_s14, 4  ;;  %s29_s13 = int_to_ptr.vmem [resolvable:$true] %s28_s13  ;;  %s478_s15 = int_to_ptr.vmem [resolvable:$true] %s16_s15 }
   0x4   :  { %s356_s18 = scalar_lea.hbm %s570_s1, 256 }
   0x5   :  { %p357_p0 = scmp.ne.s32.totalorder %s570_s1, %s356_s18  ;;  %p360_p1 = scmp.lt.u32.totalorder %s356_s18, %s570_s1 }
   0x7   :  { %p362_p2 = pnand %p360_p1, %p357_p0 }
   0x9   :  { %365 = shalt.err (!%p362_p2)
}
   0xa   :  { %s366_s23 = scalar_lea.vmem %s29_s13, 256  ;;  %p371_p4 = scmp.lt.s32.totalorder %s29_s13, %s29_s13 }
   0xb   :  { %p367_p3 = scmp.ne.s32.totalorder %s29_s13, %s366_s23  ;;  %p372_p5 = scmp.lt.s32.totalorder %s366_s23, %s366_s23 }
   0xd   :  { %p373_p6 = por %p372_p5, %p371_p4 }
   0xf   :  { %p374_p7 = pnand %p373_p6, %p367_p3 }
  0x11   :  { %377 = shalt.err (!%p374_p7)
}
  0x12   :  { %s452_s24 = smov 128   ;;  %s453_s25 = smov 8  }
  0x13   :  { %34 = dma.hbm_to_vmem [thread:$0]  %s570_s1, 256, %s29_s13, [#allocation6], %s452_s24, %s452_s24, %s453_s25  }
  0x14   :  { %s378_s30 = scalar_lea.hbm %s569_s0, 256 }
  0x15   :  { %p379_p8 = scmp.ne.s32.totalorder %s569_s0, %s378_s30  ;;  %p382_p9 = scmp.lt.u32.totalorder %s378_s30, %s569_s0 }
  0x17   :  { %p384_p10 = pnand %p382_p9, %p379_p8 }
  0x19   :  { %387 = shalt.err (!%p384_p10)
}
  0x1a   :  { %s388_s8 = scalar_lea.vmem %s478_s15, 256  ;;  %p393_p12 = scmp.lt.s32.totalorder %s478_s15, %s478_s15 }
  0x1b   :  { %p389_p11 = scmp.ne.s32.totalorder %s478_s15, %s388_s8  ;;  %p394_p13 = scmp.lt.s32.totalorder %s388_s8, %s388_s8 }
  0x1d   :  { %p395_p0 = por %p394_p13, %p393_p12 }
  0x1f   :  { %p396_p1 = pnand %p395_p0, %p389_p11 }
  0x21   :  { %399 = shalt.err (!%p396_p1)
}
  0x22   :  { %22 = dma.hbm_to_vmem [thread:$0]  %s569_s0, 256, %s478_s15, [#allocation3], %s452_s24, %s452_s24, %s453_s25  }
  0x23   :  { %s454_s10 = smov [#allocation7]   ;;  %s400_s14 = scalar_lea.hbm %s571_s2, 256 }
  0x24   :  { %s40_s11 = sshll.u32 %s454_s10, 4  ;;  %p401_p2 = scmp.ne.s32.totalorder %s571_s2, %s400_s14  ;;  %s41_s11 = int_to_ptr.vmem [resolvable:$true] %s40_s11 }
  0x25   :  { %p404_p3 = scmp.lt.u32.totalorder %s400_s14, %s571_s2 }
  0x27   :  { %p406_p4 = pnand %p404_p3, %p401_p2 }
  0x29   :  { %409 = shalt.err (!%p406_p4)
}
  0x2a   :  { %s410_s20 = scalar_lea.vmem %s41_s11, 256  ;;  %p415_p6 = scmp.lt.s32.totalorder %s41_s11, %s41_s11 }
  0x2b   :  { %p411_p5 = scmp.ne.s32.totalorder %s41_s11, %s410_s20  ;;  %p416_p7 = scmp.lt.s32.totalorder %s410_s20, %s410_s20 }
  0x2d   :  { %p417_p8 = por %p416_p7, %p415_p6 }
  0x2f   :  { %p418_p9 = pnand %p417_p8, %p411_p5 }
  0x31   :  { %421 = shalt.err (!%p418_p9)
}
  0x32   :  { %46 = dma.hbm_to_vmem [thread:$0]  %s571_s2, 256, %s41_s11, [#allocation6], %s452_s24, %s452_s24, %s453_s25  }
  0x33   :  { %444 = dma.done.wait [#allocation3], 256  }
  0x34   :  { %445 = vsyncadd [#allocation3], 4294967040 }
  0x35   :  { %446 = dma.done.wait [#allocation6], 512  }
  0x36   :  { %447 = vsyncadd [#allocation6], 4294966784  ;;  %v455_v0 = vmov 0.0   ;;  %vm456_vm0 = vmmov 0   ;;  %v532_v1 = vld [vmem:[#allocation5] sm:$0xff]  ;;  %v534_v2 = vld [vmem:[#allocation5 + $0x8] sm:$0xff] }
  0x37   :  { %316 = vmatprep.subr.bf16.mxu0 %v455_v0  ;;  %322 = vmatprep.subr.bf16.mxu1 %v455_v0  ;;  %v65_v3 = vmul.f32 0.125, %v532_v1  ;;  %v66_v4 = vmul.f32 0.125, %v534_v2  ;;  %vm69_vm1 = vcmask 261120   ;;  %v57_v9 = vld [vmem:[#allocation2] sm:$0xff]  ;;  %v58_v10 = vld [vmem:[#allocation2 + $0x8] sm:$0xff]  ;;  %vm162_vm2 = vcmask 64512  }
  0x38   :  { %318 = vmatprep.mubr.msk.bf16.mxu0 %vm456_vm0, %v455_v0  ;;  %324 = vmatprep.mubr.msk.bf16.mxu1 %vm456_vm0, %v455_v0  ;;  %v63_v11 = vpack.c.bf16 %v57_v9, %v57_v9  ;;  %v64_v12 = vpack.c.bf16 %v58_v10, %v58_v10  ;;  %vm196_vm3 = vcmask 1043456   ;;  %v61_v37 = vld [vmem:[#allocation7] sm:$0xff]  ;;  %v62_v41 = vld [vmem:[#allocation7 + $0x8] sm:$0xff]  ;;  %s457_s2 = smov [#allocation8]  }
  0x39   :  { %v67_v5 = vpack.c.bf16 %v65_v3, %v65_v3  ;;  %v68_v6 = vpack.c.bf16 %v66_v4, %v66_v4  ;;  %vm185_vm4 = vcmp.lt.u32.totalorder %v61_v37, 2147483648  ;;  %vm186_vm5 = vcmp.lt.u32.totalorder %v62_v41, 2147483648  ;;  %s291_s21 = sshll.u32 %s457_s2, 4  ;;  %s292_s21 = int_to_ptr.vmem [resolvable:$true] %s291_s21 }
  0x3a   :  { %v197_v33 = vsel %vm196_vm3, %v63_v11, 0  ;;  %v242_v34 = vsel %vm196_vm3, %v64_v12, 0  ;;  %s422_s22 = scalar_lea.vmem %s292_s21, 256  ;;  %p427_p11 = scmp.lt.s32.totalorder %s292_s21, %s292_s21 }
  0x3b   :  { %v74_v7 = vsel %vm69_vm1, %v67_v5, 0  ;;  %v120_v8 = vsel %vm69_vm1, %v68_v6, 0  ;;  %p423_p10 = scmp.ne.s32.totalorder %s292_s21, %s422_s22  ;;  %p428_p12 = scmp.lt.s32.totalorder %s422_s22, %s422_s22 }
  0x3c   :  { %317 = vmatpush3.bf16.xpose.msra.mxu0 %v74_v7  ;;  %323 = vmatpush3.bf16.xpose.msra.mxu1 %v120_v8 }
  0x3d   :  { %328 = vmatprep.subr.bf16.mxu0 %v455_v0  ;;  %334 = vmatprep.subr.bf16.mxu1 %v455_v0  ;;  %p429_p13 = por %p428_p12, %p427_p11 }
  0x3f   :  { %p430_p0 = pnand %p429_p13, %p423_p10 }
  0x43   :  { %319 = vmatmul.mubr.msk.bf16.vlgmr.msra.gmra.mrb[0].mxu0 %vm69_vm1, %v63_v11  ;;  %325 = vmatmul.mubr.msk.bf16.vlgmr.msra.gmra.mrb[0].mxu1 %vm69_vm1, %v64_v12 }
  0x44   :  { %330 = vmatprep.mubr.msk.bf16.mxu0 %vm456_vm0, %v455_v0  ;;  %336 = vmatprep.mubr.msk.bf16.mxu1 %vm456_vm0, %v455_v0 }
  0x45   :  { %329 = vmatpush3.bf16.msra.mxu0 %v197_v33  ;;  %335 = vmatpush3.bf16.msra.mxu1 %v242_v34 }
 0x116   :  { %v110_v13 = vpop.f32.mrb[0].mxu0  ;;  %v156_v14 = vpop.f32.mrb[0].mxu1 }
 0x117   :  { %v320_v15 = vpop.f32.mrb[1].mxu0  ;;  %v326_v16 = vpop.f32.mrb[1].mxu1  ;;  %v163_v17 = vsel %vm162_vm2, %v110_v13, -inf  ;;  %v166_v22 = vsel %vm162_vm2, %v156_v14, -inf }
 0x118   :  { %164 = vmax.xlane.f32.xlu0 %v163_v17  ;;  %v113_v18 = vpop.f32.mrb[2].mxu0  ;;  %v159_v19 = vpop.f32.mrb[2].mxu1 }
 0x119   :  { %v321_v20 = vpop.f32.mrb[3].mxu0  ;;  %v327_v21 = vpop.f32.mrb[3].mxu1 }
 0x11c   :  { %167 = vmax.xlane.f32.xlu0 %v166_v22 }
 0x1a5   :  { %v165_v23 = vpop.xlane.xlu0 %164 }
 0x1a6   :  { %v169_v24 = vsub.f32 %v110_v13, %v165_v23 }
 0x1a8   :  { %v171_v25 = vmul.f32 1.442695, %v169_v24 }
 0x1a9   :  { %v168_v26 = vpop.xlane.xlu0 %167 }
 0x1aa   :  { %348 = vpow2.f32 %v171_v25  ;;  %v170_v27 = vsub.f32 %v156_v14, %v168_v26 }
 0x1ac   :  { %v173_v28 = vmul.f32 1.442695, %v170_v27 }
 0x1ae   :  { %350 = vpow2.f32 %v173_v28 }
 0x1b4   :  { %v349_v29 = vpop.eup %348 }
 0x1b5   :  { %v175_v30 = vsel %vm162_vm2, %v349_v29, 0.0 }
 0x1b6   :  { %176 = vadd.xlane.f32.xlu1 %v175_v30 }
 0x1b8   :  { %v351_v31 = vpop.eup %350 }
 0x1b9   :  { %v178_v32 = vsel %vm162_vm2, %v351_v31, 0.0 }
 0x1ba   :  { %179 = vadd.xlane.f32.xlu1 %v178_v32 }
 0x243   :  { %v177_v35 = vpop.xlane.xlu1 %176 }
 0x244   :  { %352 = vrcp.f32 %v177_v35 }
 0x247   :  { %v180_v36 = vpop.xlane.xlu1 %179 }
 0x248   :  { %354 = vrcp.f32 %v180_v36 }
 0x24e   :  { %v353_v38 = vpop.eup %352 }
 0x24f   :  { %v183_v39 = vmul.f32 2.0, %v353_v38 }
 0x251   :  { %v187_v40 = vmul.f32 %v349_v29, %v183_v39 }
 0x252   :  { %v355_v42 = vpop.eup %354 }
 0x253   :  { %v189_v43 = vsel %vm185_vm4, %v187_v40, 0.0  ;;  %v184_v44 = vmul.f32 2.0, %v355_v42 }
 0x254   :  { %v191_v45 = vpack.c.bf16 %v189_v43, %v189_v43 }
 0x255   :  { %v188_v46 = vmul.f32 %v351_v31, %v184_v44 }
 0x256   :  { %331 = vmatmul.mubr.msk.bf16.vlgmr.msra.gmra.mrb[4].mxu0 %vm162_vm2, %v191_v45 }
 0x257   :  { %v190_v47 = vsel %vm186_vm5, %v188_v46, 0.0 }
 0x258   :  { %v192_v48 = vpack.c.bf16 %v190_v47, %v190_v47 }
 0x25a   :  { %337 = vmatmul.mubr.msk.bf16.vlgmr.msra.gmra.mrb[4].mxu1 %vm162_vm2, %v192_v48 }
 0x329   :  { %v233_v49 = vpop.f32.mrb[4].mxu0 }
 0x32a   :  { %v234_v50 = vadd.f32 %v233_v49, %v532_v1  ;;  %v332_v51 = vpop.f32.mrb[5].mxu0 }
 0x32b   :  { %v236_v52 = vpop.f32.mrb[6].mxu0 }
 0x32c   :  { %284 = vst.msk [vmem:[#allocation8] sm:$0xff] %vm69_vm1, %v234_v50  ;;  %v333_v53 = vpop.f32.mrb[7].mxu0 }
 0x32d   :  { %v278_v54 = vpop.f32.mrb[4].mxu1 }
 0x32e   :  { %v279_v55 = vadd.f32 %v278_v54, %v534_v2  ;;  %v338_v56 = vpop.f32.mrb[5].mxu1 }
 0x32f   :  { %v281_v57 = vpop.f32.mrb[6].mxu1 }
 0x330   :  { %285 = vst.msk [vmem:[#allocation8 + $0x8] sm:$0xff] %vm69_vm1, %v279_v55  ;;  %v339_v58 = vpop.f32.mrb[7].mxu1 }
 0x331   :  { %433 = shalt.err (!%p430_p0)
}
 0x332   :  { %s434_s27 = scalar_lea.hbm %s572_s3, 256 }
 0x333   :  { %p435_p1 = scmp.ne.s32.totalorder %s572_s3, %s434_s27  ;;  %p438_p2 = scmp.lt.u32.totalorder %s434_s27, %s572_s3 }
 0x335   :  { %p440_p3 = pnand %p438_p2, %p435_p1 }
 0x337   :  { %443 = shalt.err (!%p440_p3)
}
 0x338   :  { %297 = dma.vmem_to_hbm [thread:$0]  %s292_s21, 256, %s572_s3, [#allocation4], %s452_s24, %s452_s24, %s453_s25  }
 0x339   :  { %448 = dma.done.wait [#allocation4], 256  }
 0x33a   :  { %449 = vsyncadd [#allocation4], 4294967040 }
 0x33b   :  { %301 = vsyncpa [#allocation3], 1 }
 0x33c   :  { %302 = vsyncpa [#allocation6], 1 }
 0x33d   :  { %303 = vsyncpa [#allocation4], 1 }

</bundles_post_ra>
